<compile_context>
chip_gen: v6e
topology: v6e:2x2x1
jax: 0.10.0
libtpu: 0.0.40
codegen_flags: <defaults>
</compile_context>

<pallas_src>
import jax
import jax.numpy as jnp
from jax.experimental import pallas as pl
from jax.experimental.pallas import tpu as pltpu

SILU_SCALE = 1.0 / 0.6


def _scaled_silu(u):
    return u * jax.nn.sigmoid(u) * SILU_SCALE


def _round_up(a, m):
    return ((a + m - 1) // m) * m


def _gated_equiv_kernel(x_ref, v_ref,
                        w_vec1_ref, w_vec2_ref,      # (H, H), (H, O)
                        w_up1x_ref, w_up1v_ref,      # (H, H), (H, H)
                        b_up1_ref,                   # (1, H)  f32
                        w_up2_ref,                   # (H, 2O) pre-scaled by 1/0.6
                        b_up2_ref,                   # (1, 2O) f32
                        x_out_ref, v_out_ref):
    h = x_ref.shape[-1]
    o = x_out_ref.shape[-1]
    cd = w_vec1_ref.dtype                            # MXU operand dtype (bf16 or f32)

    # ---- vec1 = || vec1_proj(v) ||_2 over the 3 spatial components -------------
    sq = None
    for c in range(3):
        vc = v_ref[:, c * h:(c + 1) * h].astype(cd)                       # (TN, H)
        pc = jnp.dot(vc, w_vec1_ref[...], preferred_element_type=jnp.float32)
        sq = pc * pc if sq is None else sq + pc * pc
    vec1 = jnp.sqrt(sq)                                                    # (TN, H) f32

    # ---- update_net[0] on cat([x, vec1], -1): concat folded into 2 matmuls -----
    u = (jnp.dot(x_ref[...].astype(cd), w_up1x_ref[...],
                 preferred_element_type=jnp.float32)
         + jnp.dot(vec1.astype(cd), w_up1v_ref[...],
                   preferred_element_type=jnp.float32)
         + b_up1_ref[...])
    hact = u * jax.nn.sigmoid(u)          # SiLU; the 1/0.6 is folded into w_up2

    # ---- update_net[2]: fused (H, 2O) weight -> [scalar part | gate] -----------
    out2 = (jnp.dot(hact.astype(cd), w_up2_ref[...],
                    preferred_element_type=jnp.float32) + b_up2_ref[...])  # (TN, 2O)
    gate = out2[:, o:]                                                     # (TN, O)

    x_out_ref[...] = _scaled_silu(out2[:, :o]).astype(x_out_ref.dtype)

    # ---- vec2_proj last, gate fused into its epilogue; single full-block store --
    v_cols = []
    for c in range(3):
        vc = v_ref[:, c * h:(c + 1) * h].astype(cd)
        v_cols.append(gate * jnp.dot(vc, w_vec2_ref[...],
                                     preferred_element_type=jnp.float32))
    v_out_ref[...] = jnp.concatenate(v_cols, axis=-1).astype(v_out_ref.dtype)


def make_params(key, hidden_channels, out_channels):
    """Deterministic xavier_uniform weights / zero biases (matches reset_parameters)."""
    H, O = hidden_channels, out_channels
    ks = jax.random.split(key, 4)

    def xavier(k, shape):  # shape = (fan_out, fan_in) like torch Linear weight
        fan_out, fan_in = shape
        bound = (6.0 / (fan_in + fan_out)) ** 0.5
        return jax.random.uniform(k, shape, jnp.float32, -bound, bound)

    return {
        "w_vec1": xavier(ks[0], (H, H)),        # vec1_proj.weight
        "w_vec2": xavier(ks[1], (O, H)),        # vec2_proj.weight
        "w_up1": xavier(ks[2], (H, 2 * H)),     # update_net[0].weight
        "b_up1": jnp.zeros((H,), jnp.float32),
        "w_up2": xavier(ks[3], (2 * O, H)),     # update_net[2].weight
        "b_up2": jnp.zeros((2 * O,), jnp.float32),
    }


def _choose_tile(N, H, O, x_bytes, v_bytes, w_bytes, tile_n):
    """Node-tile size + vmem limit from a footprint estimate (generation-aware)."""
    try:
        info = pltpu.get_tpu_info()
        vmem_cap = int(getattr(info, "vmem_capacity_bytes", 64 * 1024 * 1024))
    except Exception:
        vmem_cap = 64 * 1024 * 1024            # conservative: v7x per-core VMEM
    budget = vmem_cap // 2                     # headroom for compiler scratch

    def footprint(tn):
        io = 2 * tn * (H * x_bytes + 3 * H * v_bytes     # x, v (double-buffered)
                       + 4 * O + 12 * O)                 # x_out, v_out (f32)
        w = 2 * w_bytes * (3 * H * H + 3 * H * O) + 2 * 4 * (H + 2 * O)
        inter = 4 * tn * (4 * H + 7 * O)                 # f32 temporaries (rough)
        return io + w + inter

    if N <= 8:
        tn = N
    else:
        # >= 2 grid steps when possible (2 TensorCores on v7x), sublane multiple of 8.
        tn = min(tile_n, max(8, _round_up(pl.cdiv(N, 2), 8)))
        while tn > 8 and footprint(tn) > budget:
            tn = max(8, _round_up(tn // 2, 8))
    vmem_limit = int(min(vmem_cap * 9 // 10,
                         max(32 * 1024 * 1024, 2 * footprint(max(tn, 8)))))
    return tn, vmem_limit


def gated_equivariant_block(x, v, params, *, tile_n=1024,
                            compute_dtype=jnp.bfloat16):
    """x: (N, H) ; v: (N, 3, H)  ->  (x_out (N, O) f32, v_out (N, 3, O) f32)."""
    N, H = x.shape
    O = params["w_vec2"].shape[0]
    cd = compute_dtype

    # Weight prep (tiny, once per call): (in, out) layout, compute-dtype cast,
    # hidden ScaledSiLU's 1/0.6 folded into update_net[2]'s weight.
    w_vec1 = params["w_vec1"].T.astype(cd)                      # (H, H)
    w_vec2 = params["w_vec2"].T.astype(cd)                      # (H, O)
    w_up1x = params["w_up1"][:, :H].T.astype(cd)                # (H, H)
    w_up1v = params["w_up1"][:, H:].T.astype(cd)                # (H, H)
    w_up2 = (params["w_up2"].T * SILU_SCALE).astype(cd)         # (H, 2O)
    b_up1 = params["b_up1"].reshape(1, H).astype(jnp.float32)
    b_up2 = params["b_up2"].reshape(1, 2 * O).astype(jnp.float32)

    # v streams as a contiguous (N, 3H) slab -- free reshape, no transpose pass.
    v_flat = v.reshape(N, 3 * H)

    tn, vmem_limit = _choose_tile(N, H, O, x.dtype.itemsize, v.dtype.itemsize,
                                  jnp.dtype(cd).itemsize, tile_n)
    grid = (pl.cdiv(N, tn),)   # ragged last block: OOB reads harmless, writes clipped

    x_out, v_out_flat = pl.pallas_call(
        _gated_equiv_kernel,
        out_shape=(jax.ShapeDtypeStruct((N, O), jnp.float32),
                   jax.ShapeDtypeStruct((N, 3 * O), jnp.float32)),
        grid=grid,
        in_specs=[
            pl.BlockSpec((tn, H), lambda i: (i, 0)),            # x tile
            pl.BlockSpec((tn, 3 * H), lambda i: (i, 0)),        # v tile (flat)
            pl.BlockSpec((H, H), lambda i: (0, 0)),             # vec1_proj.T
            pl.BlockSpec((H, O), lambda i: (0, 0)),             # vec2_proj.T
            pl.BlockSpec((H, H), lambda i: (0, 0)),             # update_net[0].T (x half)
            pl.BlockSpec((H, H), lambda i: (0, 0)),             # update_net[0].T (vec1 half)
            pl.BlockSpec((1, H), lambda i: (0, 0)),             # b_up1
            pl.BlockSpec((H, 2 * O), lambda i: (0, 0)),         # update_net[2].T (scaled)
            pl.BlockSpec((1, 2 * O), lambda i: (0, 0)),         # b_up2
        ],
        out_specs=(
            pl.BlockSpec((tn, O), lambda i: (i, 0)),
            pl.BlockSpec((tn, 3 * O), lambda i: (i, 0)),
        ),
        compiler_params=pltpu.CompilerParams(
            dimension_semantics=("parallel",),
            vmem_limit_bytes=vmem_limit,
        ),
    )(x, v_flat, w_vec1, w_vec2, w_up1x, w_up1v, b_up1, w_up2, b_up2)

    return x_out, v_out_flat.reshape(N, 3, O)   # free reshape


def _reference(x, v, params, operand_dtype=jnp.float32):
    """Pure-JAX reference mirroring the PyTorch forward; `operand_dtype` optionally
    rounds matmul operands to mimic the kernel's bf16 streaming."""
    f32 = jnp.float32
    rd = lambda a: a.astype(operand_dtype).astype(f32)
    O = params["w_vec2"].shape[0]
    x, v = rd(x), rd(v)
    vec1 = jnp.linalg.norm(v @ rd(params["w_vec1"]).T, axis=-2)      # (N, H)
    vec2 = v @ rd(params["w_vec2"]).T                                # (N, 3, O)
    h = jnp.concatenate([x, rd(vec1)], axis=-1)                      # (N, 2H)
    h = _scaled_silu(h @ rd(params["w_up1"]).T + params["b_up1"])    # (N, H)
    out = rd(h) @ rd(params["w_up2"]).T + params["b_up2"]            # (N, 2O)
    x_out, gate = out[:, :O], out[:, O:]
    return _scaled_silu(x_out), gate[:, None, :] * vec2


def _max_rel_err(a, b):
    return float(jnp.max(jnp.abs(a - b)) / (jnp.max(jnp.abs(b)) + 1e-6))


if __name__ == "__main__":
    key = jax.random.PRNGKey(0)
    kx, kv, kp = jax.random.split(key, 3)

    # Case 1: tiny single-tile config, f32 compute path.
    N, HID, OUT = 8, 32, 16
    params = make_params(kp, HID, OUT)
    x = jax.random.normal(kx, (N, HID), jnp.float32)
    v = jax.random.normal(kv, (N, 3, HID), jnp.float32)

    xo, vo = gated_equivariant_block(x, v, params, compute_dtype=jnp.float32)
    jax.block_until_ready((xo, vo))
    xr, vr = _reference(x, v, params)
    assert xo.shape == (N, OUT) and vo.shape == (N, 3, OUT)
    assert _max_rel_err(xo, xr) < 1e-2
    assert _max_rel_err(vo, vr) < 1e-2

    # Case 2: multi-tile ragged grid (N % tn != 0), bf16 fast path on f32 inputs.
    N2 = 200
    kx2, kv2 = jax.random.split(kx)
    x2 = jax.random.normal(kx2, (N2, HID), jnp.float32)
    v2 = jax.random.normal(kv2, (N2, 3, HID), jnp.float32)
    xo2, vo2 = gated_equivariant_block(x2, v2, params, tile_n=64)
    jax.block_until_ready((xo2, vo2))
    xr2, vr2 = _reference(x2, v2, params, operand_dtype=jnp.bfloat16)
    assert xo2.shape == (N2, OUT) and vo2.shape == (N2, 3, OUT)
    assert _max_rel_err(xo2, xr2) < 3e-2
    assert _max_rel_err(vo2, vr2) < 3e-2

    # Case 3: lane-aligned config (H, O multiples of 128) streaming bf16 activations
    # directly -- the intended production path (no extra passes, half the HBM bytes).
    N3, HID3, OUT3 = 200, 128, 128
    kp3, kx3, kv3 = jax.random.split(kp, 3)
    params3 = make_params(kp3, HID3, OUT3)
    x3 = jax.random.normal(kx3, (N3, HID3), jnp.float32).astype(jnp.bfloat16)
    v3 = jax.random.normal(kv3, (N3, 3, HID3), jnp.float32).astype(jnp.bfloat16)
    xo3, vo3 = gated_equivariant_block(x3, v3, params3)
    jax.block_until_ready((xo3, vo3))
    xr3, vr3 = _reference(x3, v3, params3, operand_dtype=jnp.bfloat16)
    assert xo3.shape == (N3, OUT3) and vo3.shape == (N3, 3, OUT3)
    assert _max_rel_err(xo3, xr3) < 3e-2
    assert _max_rel_err(vo3, vr3) < 3e-2

    print("KERNEL_OK")
</pallas_src>

<mosaic_0001>
module attributes {stable_mosaic.version = 11 : i64} {
  func.func @_gated_equiv_kernel(%arg0: i32, %arg1: memref<8x32xf32, #tpu.memory_space<vmem>>, %arg2: memref<8x96xf32, #tpu.memory_space<vmem>>, %arg3: memref<32x32xf32, #tpu.memory_space<vmem>>, %arg4: memref<32x16xf32, #tpu.memory_space<vmem>>, %arg5: memref<32x32xf32, #tpu.memory_space<vmem>>, %arg6: memref<32x32xf32, #tpu.memory_space<vmem>>, %arg7: memref<1x32xf32, #tpu.memory_space<vmem>>, %arg8: memref<32x32xf32, #tpu.memory_space<vmem>>, %arg9: memref<1x32xf32, #tpu.memory_space<vmem>>, %arg10: memref<8x16xf32, #tpu.memory_space<vmem>>, %arg11: memref<8x48xf32, #tpu.memory_space<vmem>>) attributes {dimension_semantics = [#tpu.dimension_semantics<parallel>], iteration_bounds = array<i64: 1>, scalar_prefetch = 0 : i64, scratch_operands = 0 : i64, tpu.core_type = #tpu.core_type<tc>, window_params = [{transform_indices = @transform_0, window_bounds = array<i64: 8, 32>}, {transform_indices = @transform_1, window_bounds = array<i64: 8, 96>}, {pipeline_mode = #tpu.pipeline_mode<synchronous>, transform_indices = @transform_2, window_bounds = array<i64: 32, 32>}, {pipeline_mode = #tpu.pipeline_mode<synchronous>, transform_indices = @transform_3, window_bounds = array<i64: 32, 16>}, {pipeline_mode = #tpu.pipeline_mode<synchronous>, transform_indices = @transform_4, window_bounds = array<i64: 32, 32>}, {pipeline_mode = #tpu.pipeline_mode<synchronous>, transform_indices = @transform_5, window_bounds = array<i64: 32, 32>}, {pipeline_mode = #tpu.pipeline_mode<synchronous>, transform_indices = @transform_6, window_bounds = array<i64: 1, 32>}, {pipeline_mode = #tpu.pipeline_mode<synchronous>, transform_indices = @transform_7, window_bounds = array<i64: 32, 32>}, {pipeline_mode = #tpu.pipeline_mode<synchronous>, transform_indices = @transform_8, window_bounds = array<i64: 1, 32>}, {transform_indices = @transform_9, window_bounds = array<i64: 8, 16>}, {transform_indices = @transform_10, window_bounds = array<i64: 8, 48>}]} {
    %c0 = arith.constant 0 : index
    %c0_0 = arith.constant 0 : index
    %0 = vector.load %arg2[%c0, %c0_0] : memref<8x96xf32, #tpu.memory_space<vmem>>, vector<8x32xf32>
    %c0_1 = arith.constant 0 : index
    %c0_2 = arith.constant 0 : index
    %1 = vector.load %arg3[%c0_1, %c0_2] : memref<32x32xf32, #tpu.memory_space<vmem>>, vector<32x32xf32>
    %cst = arith.constant dense<0.000000e+00> : vector<8x32xf32>
    %2 = tpu.matmul %0, %1, %cst {dimension_numbers = #tpu.dot_dimension_numbers<[1], [0], [0], [1], [0, 0, 1, 1], [], []>} : vector<8x32xf32>, vector<32x32xf32>, vector<8x32xf32> -> vector<8x32xf32>
    %3 = arith.mulf %2, %2 : vector<8x32xf32>
    %c0_3 = arith.constant 0 : index
    %c32 = arith.constant 32 : index
    %4 = vector.load %arg2[%c0_3, %c32] : memref<8x96xf32, #tpu.memory_space<vmem>>, vector<8x32xf32>
    %c0_4 = arith.constant 0 : index
    %c0_5 = arith.constant 0 : index
    %5 = vector.load %arg3[%c0_4, %c0_5] : memref<32x32xf32, #tpu.memory_space<vmem>>, vector<32x32xf32>
    %cst_6 = arith.constant dense<0.000000e+00> : vector<8x32xf32>
    %6 = tpu.matmul %4, %5, %cst_6 {dimension_numbers = #tpu.dot_dimension_numbers<[1], [0], [0], [1], [0, 0, 1, 1], [], []>} : vector<8x32xf32>, vector<32x32xf32>, vector<8x32xf32> -> vector<8x32xf32>
    %7 = arith.mulf %6, %6 : vector<8x32xf32>
    %8 = arith.addf %3, %7 : vector<8x32xf32>
    %c0_7 = arith.constant 0 : index
    %c64 = arith.constant 64 : index
    %9 = vector.load %arg2[%c0_7, %c64] : memref<8x96xf32, #tpu.memory_space<vmem>>, vector<8x32xf32>
    %c0_8 = arith.constant 0 : index
    %c0_9 = arith.constant 0 : index
    %10 = vector.load %arg3[%c0_8, %c0_9] : memref<32x32xf32, #tpu.memory_space<vmem>>, vector<32x32xf32>
    %cst_10 = arith.constant dense<0.000000e+00> : vector<8x32xf32>
    %11 = tpu.matmul %9, %10, %cst_10 {dimension_numbers = #tpu.dot_dimension_numbers<[1], [0], [0], [1], [0, 0, 1, 1], [], []>} : vector<8x32xf32>, vector<32x32xf32>, vector<8x32xf32> -> vector<8x32xf32>
    %12 = arith.mulf %11, %11 : vector<8x32xf32>
    %13 = arith.addf %8, %12 : vector<8x32xf32>
    %14 = math.sqrt %13 : vector<8x32xf32>
    %c0_11 = arith.constant 0 : index
    %c0_12 = arith.constant 0 : index
    %15 = vector.load %arg1[%c0_11, %c0_12] : memref<8x32xf32, #tpu.memory_space<vmem>>, vector<8x32xf32>
    %c0_13 = arith.constant 0 : index
    %c0_14 = arith.constant 0 : index
    %16 = vector.load %arg5[%c0_13, %c0_14] : memref<32x32xf32, #tpu.memory_space<vmem>>, vector<32x32xf32>
    %cst_15 = arith.constant dense<0.000000e+00> : vector<8x32xf32>
    %17 = tpu.matmul %15, %16, %cst_15 {dimension_numbers = #tpu.dot_dimension_numbers<[1], [0], [0], [1], [0, 0, 1, 1], [], []>} : vector<8x32xf32>, vector<32x32xf32>, vector<8x32xf32> -> vector<8x32xf32>
    %c0_16 = arith.constant 0 : index
    %c0_17 = arith.constant 0 : index
    %18 = vector.load %arg6[%c0_16, %c0_17] : memref<32x32xf32, #tpu.memory_space<vmem>>, vector<32x32xf32>
    %cst_18 = arith.constant dense<0.000000e+00> : vector<8x32xf32>
    %19 = tpu.matmul %14, %18, %cst_18 {dimension_numbers = #tpu.dot_dimension_numbers<[1], [0], [0], [1], [0, 0, 1, 1], [], []>} : vector<8x32xf32>, vector<32x32xf32>, vector<8x32xf32> -> vector<8x32xf32>
    %20 = arith.addf %17, %19 : vector<8x32xf32>
    %c0_19 = arith.constant 0 : index
    %c0_20 = arith.constant 0 : index
    %21 = vector.load %arg7[%c0_19, %c0_20] : memref<1x32xf32, #tpu.memory_space<vmem>>, vector<1x32xf32>
    %22 = vector.broadcast %21 : vector<1x32xf32> to vector<8x32xf32>
    %23 = arith.addf %20, %22 : vector<8x32xf32>
    %24 = arith.negf %23 : vector<8x32xf32>
    %25 = math.exp %24 : vector<8x32xf32>
    %cst_21 = arith.constant 1.000000e+00 : f32
    %26 = vector.broadcast %cst_21 : f32 to vector<8x32xf32>
    %27 = arith.addf %26, %25 : vector<8x32xf32>
    %28 = arith.divf %26, %27 : vector<8x32xf32>
    %29 = arith.mulf %23, %28 : vector<8x32xf32>
    %c0_22 = arith.constant 0 : index
    %c0_23 = arith.constant 0 : index
    %30 = vector.load %arg8[%c0_22, %c0_23] : memref<32x32xf32, #tpu.memory_space<vmem>>, vector<32x32xf32>
    %cst_24 = arith.constant dense<0.000000e+00> : vector<8x32xf32>
    %31 = tpu.matmul %29, %30, %cst_24 {dimension_numbers = #tpu.dot_dimension_numbers<[1], [0], [0], [1], [0, 0, 1, 1], [], []>} : vector<8x32xf32>, vector<32x32xf32>, vector<8x32xf32> -> vector<8x32xf32>
    %c0_25 = arith.constant 0 : index
    %c0_26 = arith.constant 0 : index
    %32 = vector.load %arg9[%c0_25, %c0_26] : memref<1x32xf32, #tpu.memory_space<vmem>>, vector<1x32xf32>
    %33 = vector.broadcast %32 : vector<1x32xf32> to vector<8x32xf32>
    %34 = arith.addf %31, %33 : vector<8x32xf32>
    %35 = vector.extract_strided_slice %34 {offsets = [0, 16], sizes = [8, 16], strides = [1, 1]} : vector<8x32xf32> to vector<8x16xf32>
    %36 = vector.extract_strided_slice %34 {offsets = [0, 0], sizes = [8, 16], strides = [1, 1]} : vector<8x32xf32> to vector<8x16xf32>
    %37 = arith.negf %36 : vector<8x16xf32>
    %38 = math.exp %37 : vector<8x16xf32>
    %cst_27 = arith.constant 1.000000e+00 : f32
    %39 = vector.broadcast %cst_27 : f32 to vector<8x16xf32>
    %40 = arith.addf %39, %38 : vector<8x16xf32>
    %41 = arith.divf %39, %40 : vector<8x16xf32>
    %42 = arith.mulf %36, %41 : vector<8x16xf32>
    %cst_28 = arith.constant 1.66666663 : f32
    %43 = vector.broadcast %cst_28 : f32 to vector<8x16xf32>
    %44 = arith.mulf %42, %43 : vector<8x16xf32>
    %c0_29 = arith.constant 0 : index
    %c0_30 = arith.constant 0 : index
    %45 = vector.load %arg10[%c0_29, %c0_30] : memref<8x16xf32, #tpu.memory_space<vmem>>, vector<8x16xf32>
    tpu.vector_store %arg10[%c0_29, %c0_30], %44 {strides = array<i32>} : memref<8x16xf32, #tpu.memory_space<vmem>>, vector<8x16xf32>,
    %c0_31 = arith.constant 0 : index
    %c0_32 = arith.constant 0 : index
    %46 = vector.load %arg2[%c0_31, %c0_32] : memref<8x96xf32, #tpu.memory_space<vmem>>, vector<8x32xf32>
    %c0_33 = arith.constant 0 : index
    %c0_34 = arith.constant 0 : index
    %47 = vector.load %arg4[%c0_33, %c0_34] : memref<32x16xf32, #tpu.memory_space<vmem>>, vector<32x16xf32>
    %cst_35 = arith.constant dense<0.000000e+00> : vector<8x16xf32>
    %48 = tpu.matmul %46, %47, %cst_35 {dimension_numbers = #tpu.dot_dimension_numbers<[1], [0], [0], [1], [0, 0, 1, 1], [], []>} : vector<8x32xf32>, vector<32x16xf32>, vector<8x16xf32> -> vector<8x16xf32>
    %49 = arith.mulf %35, %48 : vector<8x16xf32>
    %c0_36 = arith.constant 0 : index
    %c32_37 = arith.constant 32 : index
    %50 = vector.load %arg2[%c0_36, %c32_37] : memref<8x96xf32, #tpu.memory_space<vmem>>, vector<8x32xf32>
    %c0_38 = arith.constant 0 : index
    %c0_39 = arith.constant 0 : index
    %51 = vector.load %arg4[%c0_38, %c0_39] : memref<32x16xf32, #tpu.memory_space<vmem>>, vector<32x16xf32>
    %cst_40 = arith.constant dense<0.000000e+00> : vector<8x16xf32>
    %52 = tpu.matmul %50, %51, %cst_40 {dimension_numbers = #tpu.dot_dimension_numbers<[1], [0], [0], [1], [0, 0, 1, 1], [], []>} : vector<8x32xf32>, vector<32x16xf32>, vector<8x16xf32> -> vector<8x16xf32>
    %53 = arith.mulf %35, %52 : vector<8x16xf32>
    %c0_41 = arith.constant 0 : index
    %c64_42 = arith.constant 64 : index
    %54 = vector.load %arg2[%c0_41, %c64_42] : memref<8x96xf32, #tpu.memory_space<vmem>>, vector<8x32xf32>
    %c0_43 = arith.constant 0 : index
    %c0_44 = arith.constant 0 : index
    %55 = vector.load %arg4[%c0_43, %c0_44] : memref<32x16xf32, #tpu.memory_space<vmem>>, vector<32x16xf32>
    %cst_45 = arith.constant dense<0.000000e+00> : vector<8x16xf32>
    %56 = tpu.matmul %54, %55, %cst_45 {dimension_numbers = #tpu.dot_dimension_numbers<[1], [0], [0], [1], [0, 0, 1, 1], [], []>} : vector<8x32xf32>, vector<32x16xf32>, vector<8x16xf32> -> vector<8x16xf32>
    %57 = arith.mulf %35, %56 : vector<8x16xf32>
    %58 = tpu.concatenate %49, %53, %57 in 1 : vector<8x16xf32>, vector<8x16xf32>, vector<8x16xf32> -> vector<8x48xf32>
    %c0_46 = arith.constant 0 : index
    %c0_47 = arith.constant 0 : index
    %59 = vector.load %arg11[%c0_46, %c0_47] : memref<8x48xf32, #tpu.memory_space<vmem>>, vector<8x48xf32>
    tpu.vector_store %arg11[%c0_46, %c0_47], %58 {strides = array<i32>} : memref<8x48xf32, #tpu.memory_space<vmem>>, vector<8x48xf32>,
    return
  }
  func.func @transform_0(%arg0: i32) -> (i32, i32) {
    %c0_i32 = arith.constant 0 : i32
    %c0_i32_0 = arith.constant 0 : i32
    return %arg0, %c0_i32 : i32, i32
  }
  func.func @transform_1(%arg0: i32) -> (i32, i32) {
    %c0_i32 = arith.constant 0 : i32
    %c0_i32_0 = arith.constant 0 : i32
    return %arg0, %c0_i32 : i32, i32
  }
  func.func @transform_2(%arg0: i32) -> (i32, i32) {
    %c0_i32 = arith.constant 0 : i32
    %c0_i32_0 = arith.constant 0 : i32
    %c0_i32_1 = arith.constant 0 : i32
    return %c0_i32, %c0_i32_0 : i32, i32
  }
  func.func @transform_3(%arg0: i32) -> (i32, i32) {
    %c0_i32 = arith.constant 0 : i32
    %c0_i32_0 = arith.constant 0 : i32
    %c0_i32_1 = arith.constant 0 : i32
    return %c0_i32, %c0_i32_0 : i32, i32
  }
  func.func @transform_4(%arg0: i32) -> (i32, i32) {
    %c0_i32 = arith.constant 0 : i32
    %c0_i32_0 = arith.constant 0 : i32
    %c0_i32_1 = arith.constant 0 : i32
    return %c0_i32, %c0_i32_0 : i32, i32
  }
  func.func @transform_5(%arg0: i32) -> (i32, i32) {
    %c0_i32 = arith.constant 0 : i32
    %c0_i32_0 = arith.constant 0 : i32
    %c0_i32_1 = arith.constant 0 : i32
    return %c0_i32, %c0_i32_0 : i32, i32
  }
  func.func @transform_6(%arg0: i32) -> (i32, i32) {
    %c0_i32 = arith.constant 0 : i32
    %c0_i32_0 = arith.constant 0 : i32
    %c0_i32_1 = arith.constant 0 : i32
    return %c0_i32, %c0_i32_0 : i32, i32
  }
  func.func @transform_7(%arg0: i32) -> (i32, i32) {
    %c0_i32 = arith.constant 0 : i32
    %c0_i32_0 = arith.constant 0 : i32
    %c0_i32_1 = arith.constant 0 : i32
    return %c0_i32, %c0_i32_0 : i32, i32
  }
  func.func @transform_8(%arg0: i32) -> (i32, i32) {
    %c0_i32 = arith.constant 0 : i32
    %c0_i32_0 = arith.constant 0 : i32
    %c0_i32_1 = arith.constant 0 : i32
    return %c0_i32, %c0_i32_0 : i32, i32
  }
  func.func @transform_9(%arg0: i32) -> (i32, i32) {
    %c0_i32 = arith.constant 0 : i32
    %c0_i32_0 = arith.constant 0 : i32
    return %arg0, %c0_i32 : i32, i32
  }
  func.func @transform_10(%arg0: i32) -> (i32, i32) {
    %c0_i32 = arith.constant 0 : i32
    %c0_i32_0 = arith.constant 0 : i32
    return %arg0, %c0_i32 : i32, i32
  }
}

</mosaic_0001>

<bundles_post_ra>
// kernel: tpu_custom_call.1
= control target key start
LH: loop header
LB: loop body
LE: loop exit
PB: predicated region body
PF: predicated region fallthrough
CT: control target
= control target key end

     0   :  { %16 = vsyncpa [#allocation3], 0  ;;  %s1370_s0 = inlined_call_operand.vmem [shape: f32[8,32], index: 0, kind: input, shape index: {}]   ;;  %s1371_s1 = inlined_call_operand.vmem [shape: f32[8,96], index: 1, kind: input, shape index: {}]   ;;  %s1372_s2 = inlined_call_operand.vmem [shape: f32[32,32], index: 2, kind: input, shape index: {}]   ;;  %s1373_s3 = inlined_call_operand.vmem [shape: f32[32,16], index: 3, kind: input, shape index: {}]   ;;  %s1374_s4 = inlined_call_operand.hbm [shape: f32[32,32], index: 4, kind: input, shape index: {}]   ;;  %s1375_s5 = inlined_call_operand.hbm [shape: f32[32,32], index: 5, kind: input, shape index: {}]   ;;  %s1376_s6 = inlined_call_operand.vmem [shape: f32[1,32], index: 6, kind: input, shape index: {}]   ;;  %s1377_s7 = inlined_call_operand.hbm [shape: f32[32,32], index: 7, kind: input, shape index: {}]   ;;  %s1378_s8 = inlined_call_operand.vmem [shape: f32[1,32], index: 8, kind: input, shape index: {}]   ;;  %s1379_s9 = inlined_call_operand.hbm [shape: f32[8,16], index: 9, kind: output, shape index: {0}]   ;;  %s1380_s10 = inlined_call_operand.hbm [shape: f32[8,48], index: 10, kind: output, shape index: {1}]  }
   0x1   :  { %17 = vsyncpa [#allocation6], 0 }
   0x2   :  { %18 = vsyncpa [#allocation4], 0 }
   0x3   :  { %19 = vsyncpa [#allocation10], 0  ;;  %s1151_s13 = smov [#allocation5]   ;;  %s1152_s15 = smov [#allocation2]  }
   0x4   :  { %s45_s14 = sshll.u32 %s1151_s13, 4  ;;  %s33_s16 = sshll.u32 %s1152_s15, 4  ;;  %s46_s14 = int_to_ptr.vmem [resolvable:$true] %s45_s14  ;;  %s34_s16 = int_to_ptr.vmem [resolvable:$true] %s33_s16 }
   0x5   :  { %s1051_s17 = scalar_lea.vmem %s46_s14, 512  ;;  %p1056_p1 = scmp.lt.s32.totalorder %s46_s14, %s46_s14 }
   0x6   :  { %p1052_p0 = scmp.ne.s32.totalorder %s46_s14, %s1051_s17  ;;  %p1057_p2 = scmp.lt.s32.totalorder %s1051_s17, %s1051_s17 }
   0x8   :  { %p1058_p3 = por %p1057_p2, %p1056_p1 }
   0xa   :  { %p1059_p4 = pnand %p1058_p3, %p1052_p0 }
   0xc   :  { %1062 = shalt.err (!%p1059_p4)
}
   0xd   :  { %s1153_s18 = smov 128   ;;  %s1154_s19 = smov 8  }
   0xe   :  { %51 = dma.hbm_to_vmem [thread:$0]  %s1375_s5, 512, %s46_s14, [#allocation6], %s1153_s18, %s1153_s18, %s1154_s19  }
   0xf   :  { %s1071_s22 = scalar_lea.vmem %s34_s16, 512  ;;  %p1076_p6 = scmp.lt.s32.totalorder %s34_s16, %s34_s16 }
  0x10   :  { %p1072_p5 = scmp.ne.s32.totalorder %s34_s16, %s1071_s22  ;;  %p1077_p7 = scmp.lt.s32.totalorder %s1071_s22, %s1071_s22 }
  0x12   :  { %p1078_p8 = por %p1077_p7, %p1076_p6 }
  0x14   :  { %p1079_p9 = pnand %p1078_p8, %p1072_p5 }
  0x16   :  { %1082 = shalt.err (!%p1079_p9)
}
  0x17   :  { %39 = dma.hbm_to_vmem [thread:$0]  %s1374_s4, 512, %s34_s16, [#allocation3], %s1153_s18, %s1153_s18, %s1154_s19  }
  0x18   :  { %s1155_s25 = smov [#allocation7]  }
  0x19   :  { %s59_s26 = sshll.u32 %s1155_s25, 4  ;;  %s60_s26 = int_to_ptr.vmem [resolvable:$true] %s59_s26 }
  0x1a   :  { %s1091_s27 = scalar_lea.vmem %s60_s26, 512  ;;  %p1096_p11 = scmp.lt.s32.totalorder %s60_s26, %s60_s26 }
  0x1b   :  { %p1092_p10 = scmp.ne.s32.totalorder %s60_s26, %s1091_s27  ;;  %p1097_p12 = scmp.lt.s32.totalorder %s1091_s27, %s1091_s27 }
  0x1d   :  { %p1098_p13 = por %p1097_p12, %p1096_p11 }
  0x1f   :  { %p1099_p0 = pnand %p1098_p13, %p1092_p10 }
  0x21   :  { %1102 = shalt.err (!%p1099_p0)
}
  0x22   :  { %65 = dma.hbm_to_vmem [thread:$0]  %s1377_s7, 512, %s60_s26, [#allocation6], %s1153_s18, %s1153_s18, %s1154_s19  }
  0x23   :  { %1143 = dma.done.wait [#allocation3], 512  }
  0x24   :  { %1144 = vsyncadd [#allocation3], 4294966784 }
  0x25   :  { %1145 = dma.done.wait [#allocation6], 1024  }
  0x26   :  { %1146 = vsyncadd [#allocation6], 4294966272  ;;  %v1156_v0 = vmov 0.0   ;;  %vm1157_vm0 = vmmov 0   ;;  %v1237_v1 = vld [vmem:[%s1371_s1] sm:$0xff]  ;;  %v81_v2 = vld [vmem:[%s1372_s2 + $0x18] sm:$0xff] }
  0x27   :  { %921 = vmatprep.subr.mxu0 %v1156_v0  ;;  %932 = vmatprep.subr.mxu1 %v1156_v0  ;;  %v80_v3 = vld [vmem:[%s1372_s2 + $0x10] sm:$0xff]  ;;  %s1158_s13 = smov 96   ;;  %v79_v4 = vld [vmem:[%s1372_s2 + $0x8] sm:$0xff]  ;;  %v78_v5 = vld [vmem:[%s1372_s2] sm:$0xff]  ;;  %s1159_s17 = smov 64   ;;  %vm82_vm1 = vcmask 261120  }
  0x28   :  { %929 = vmatprep.mubr.msk.f32.mxu0 %vm1157_vm0, %v1156_v0  ;;  %940 = vmatprep.mubr.msk.f32.mxu1 %vm1157_vm0, %v1156_v0  ;;  %v320_v8 = vld [vmem:[#allocation2 + $0x18] sm:$0xff]  ;;  %v319_v10 = vld [vmem:[#allocation2 + $0x10] sm:$0xff]  ;;  %v318_v12 = vld [vmem:[#allocation2 + $0x8] sm:$0xff]  ;;  %s1161_s28 = smov 112   ;;  %vm578_vm4 = vcmask 130048  }
  0x29   :  { %157 = vrot.lane.b32.xlu0 %v1237_v1, %s1158_s13  ;;  %922 = vmatpush3.msra.mxu0 %v81_v2  ;;  %v324_v9 = vld [vmem:[#allocation5 + $0x18] sm:$0xff]  ;;  %v323_v11 = vld [vmem:[#allocation5 + $0x10] sm:$0xff]  ;;  %v322_v13 = vld [vmem:[#allocation5 + $0x8] sm:$0xff] }
  0x2a   :  { %923 = vmatprep.subr.mxu0 %v1156_v0  ;;  %933 = vmatpush3.msra.mxu1 %v81_v2  ;;  %v317_v14 = vld [vmem:[#allocation2] sm:$0xff]  ;;  %v1296_v19 = vld [vmem:[%s1373_s3 + $0x18] sm:$0xff]  ;;  %v1301_v20 = vld [vmem:[%s1373_s3 + $0x10] sm:$0xff] }
  0x2b   :  { %924 = vmatpush3.msra.mxu0 %v80_v3  ;;  %934 = vmatprep.subr.mxu1 %v1156_v0  ;;  %v321_v15 = vld [vmem:[#allocation5] sm:$0xff]  ;;  %v1308_v21 = vld [vmem:[%s1373_s3 + $0x8] sm:$0xff]  ;;  %v489_v40 = vld [vmem:[#allocation7 + $0x18] sm:$0xff] }
  0x2c   :  { %925 = vmatprep.subr.mxu0 %v1156_v0  ;;  %935 = vmatpush3.msra.mxu1 %v80_v3  ;;  %v316_v16 = vld [vmem:[%s1370_s0] sm:$0xff]  ;;  %v488_v41 = vld [vmem:[#allocation7 + $0x10] sm:$0xff]  ;;  %v487_v42 = vld [vmem:[#allocation7 + $0x8] sm:$0xff] }
  0x2d   :  { %233 = vrot.lane.b32.xlu0 %v1237_v1, %s1159_s17  ;;  %926 = vmatpush3.msra.mxu0 %v79_v4  ;;  %v1315_v22 = vld [vmem:[%s1373_s3] sm:$0xff]  ;;  %s1160_s3 = smov 16  }
  0x2e   :  { %927 = vmatprep.subr.mxu0 %v1156_v0  ;;  %936 = vmatprep.subr.mxu1 %v1156_v0  ;;  %v486_v43 = vld [vmem:[#allocation7] sm:$0xff] }
  0x2f   :  { %928 = vmatpush3.msra.mxu0 %v78_v5  ;;  %937 = vmatpush3.msra.mxu1 %v79_v4  ;;  %v868_v49 = vld [vmem:[%s1376_s6] ss:$0 sm:$0xff] }
  0x30   :  { %930 = vmatmul.mubr.msk.f32.vlgmr.msra.gmra.mxu0 %vm82_vm1, %v1237_v1  ;;  %943 = vmatprep.subr.mxu0 %v1156_v0  ;;  %v870_v59 = vld [vmem:[%s1378_s8] ss:$0 sm:$0xff]  ;;  %s1162_s8 = smov [#allocation8]  }
  0x31   :  { %944 = vmatpush3.msra.mxu0 %v81_v2  ;;  %938 = vmatprep.subr.mxu1 %v1156_v0  ;;  %s839_s4 = sshll.u32 %s1162_s8, 4  ;;  %s840_s4 = int_to_ptr.vmem [resolvable:$true] %s839_s4 }
  0x32   :  { %945 = vmatprep.subr.mxu0 %v1156_v0  ;;  %939 = vmatpush3.msra.mxu1 %v78_v5  ;;  %s1103_s29 = scalar_lea.vmem %s840_s4, 128  ;;  %p1108_p2 = scmp.lt.s32.totalorder %s840_s4, %s840_s4 }
  0x33   :  { %946 = vmatpush3.msra.mxu0 %v80_v3  ;;  %951 = vmatprep.mubr.msk.f32.mxu0 %vm1157_vm0, %v1156_v0  ;;  %p1104_p1 = scmp.ne.s32.totalorder %s840_s4, %s1103_s29  ;;  %p1109_p3 = scmp.lt.s32.totalorder %s1103_s29, %s1103_s29 }
  0x34   :  { %947 = vmatprep.subr.mxu0 %v1156_v0  ;;  %954 = vmatprep.subr.mxu1 %v1156_v0 }
  0x35   :  { %948 = vmatpush3.msra.mxu0 %v79_v4  ;;  %742 = vrot.lane.b32.xlu1 %v1237_v1, %s1159_s17  ;;  %p1110_p4 = por %p1109_p3, %p1108_p2 }
  0x36   :  { %949 = vmatprep.subr.mxu0 %v1156_v0 }
  0x37   :  { %950 = vmatpush3.msra.mxu0 %v78_v5  ;;  %p1111_p5 = pnand %p1110_p4, %p1104_p1 }
  0x38   :  { %965 = vmatprep.subr.mxu0 %v1156_v0 }
  0x39   :  { %663 = vrot.lane.b32.xlu1 %v1237_v1, %s1158_s13 }
  0x9b   :  { %v158_v6 = vpop.permute.xlu0 %157 }
  0x9c   :  { %941 = vmatmul.mubr.msk.f32.vlgmr.msra.gmra.mxu1 %vm82_vm1, %v158_v6 }
  0x9d   :  { %962 = vmatprep.mubr.msk.f32.mxu1 %vm1157_vm0, %v1156_v0  ;;  %955 = vmatpush3.msra.mxu1 %v324_v9 }
  0x9e   :  { %956 = vmatprep.subr.mxu1 %v1156_v0 }
  0x9f   :  { %v234_v7 = vpop.permute.xlu0 %233  ;;  %957 = vmatpush3.msra.mxu1 %v323_v11 }
  0xa0   :  { %952 = vmatmul.mubr.msk.f32.vlgmr.msra.gmra.mxu0 %vm82_vm1, %v234_v7  ;;  %958 = vmatprep.subr.mxu1 %v1156_v0 }
  0xa1   :  { %973 = vmatprep.mubr.msk.f32.mxu0 %vm1157_vm0, %v1156_v0  ;;  %966 = vmatpush3.msra.mxu0 %v320_v8 }
  0xa2   :  { %967 = vmatprep.subr.mxu0 %v1156_v0  ;;  %959 = vmatpush3.msra.mxu1 %v322_v13 }
  0xa3   :  { %968 = vmatpush3.msra.mxu0 %v319_v10  ;;  %960 = vmatprep.subr.mxu1 %v1156_v0 }
  0xa4   :  { %969 = vmatprep.subr.mxu0 %v1156_v0  ;;  %961 = vmatpush3.msra.mxu1 %v321_v15 }
  0xa5   :  { %970 = vmatpush3.msra.mxu0 %v318_v12  ;;  %976 = vmatprep.subr.mxu1 %v1156_v0 }
  0xa6   :  { %971 = vmatprep.subr.mxu0 %v1156_v0 }
  0xa7   :  { %972 = vmatpush3.msra.mxu0 %v317_v14  ;;  %v743_v23 = vpop.permute.xlu1 %742 }
  0xa8   :  { %974 = vmatmul.mubr.msk.f32.vlgmr.msra.gmra.mxu0 %vm82_vm1, %v316_v16  ;;  %987 = vmatprep.subr.mxu0 %v1156_v0 }
  0xa9   :  { %995 = vmatprep.mubr.msk.f32.mxu0 %vm1157_vm0, %v1156_v0  ;;  %988 = vmatpush3.msra.mxu0 %v1296_v19 }
  0xaa   :  { %989 = vmatprep.subr.mxu0 %v1156_v0 }
  0xab   :  { %990 = vmatpush3.msra.mxu0 %v1301_v20  ;;  %v664_v58 = vpop.permute.xlu1 %663 }
  0xac   :  { %991 = vmatprep.subr.mxu0 %v1156_v0 }
  0xad   :  { %992 = vmatpush3.msra.mxu0 %v1308_v21 }
  0xae   :  { %993 = vmatprep.subr.mxu0 %v1156_v0 }
  0xaf   :  { %994 = vmatpush3.msra.mxu0 %v1315_v22 }
  0xb0   :  { %1009 = vmatprep.subr.mxu0 %v1156_v0  ;;  %996 = vmatmul.mubr.msk.f32.vlgmr.msra.gmra.mxu0 %vm82_vm1, %v1237_v1 }
  0xb1   :  { %1010 = vmatpush3.msra.mxu0 %v1296_v19  ;;  %1017 = vmatprep.mubr.msk.f32.mxu0 %vm1157_vm0, %v1156_v0 }
  0xb2   :  { %1011 = vmatprep.subr.mxu0 %v1156_v0 }
  0xb3   :  { %1012 = vmatpush3.msra.mxu0 %v1301_v20 }
  0xb4   :  { %1013 = vmatprep.subr.mxu0 %v1156_v0 }
  0xb5   :  { %1014 = vmatpush3.msra.mxu0 %v1308_v21 }
  0xb6   :  { %1015 = vmatprep.subr.mxu0 %v1156_v0 }
  0xb7   :  { %1016 = vmatpush3.msra.mxu0 %v1315_v22 }
  0xb8   :  { %1018 = vmatmul.mubr.msk.f32.vlgmr.msra.gmra.mxu0 %vm82_vm1, %v743_v23 }
  0xf0   :  { %v152_v17 = vpop.f32.mrf.mxu0 }
  0xf1   :  { %v156_v27 = vmul.f32 %v152_v17, %v152_v17 }
  0xf2   :  { %v931_v18 = vpop.f32.mrf.mxu0 }
 0x15c   :  { %v227_v24 = vpop.f32.mrf.mxu1 }
 0x15d   :  { %v231_v25 = vmul.f32 %v227_v24, %v227_v24 }
 0x15e   :  { %v942_v26 = vpop.f32.mrf.mxu1 }
 0x15f   :  { %v232_v29 = vadd.f32 %v231_v25, %v156_v27 }
 0x160   :  { %v303_v28 = vpop.f32.mrf.mxu0 }
 0x161   :  { %v307_v30 = vmul.f32 %v303_v28, %v303_v28 }
 0x162   :  { %v953_v31 = vpop.f32.mrf.mxu0 }
 0x163   :  { %v308_v32 = vadd.f32 %v307_v30, %v232_v29 }
 0x165   :  { %1033 = vrsqrt.f32 %v308_v32  ;;  %vm311_vm2 = vcmp.eq.f32.partialorder %v308_v32, inf  ;;  %v314_v35 = vand.u32 2147483648, %v308_v32  ;;  %vm313_vm3 = vcmp.eq.f32.partialorder %v308_v32, 0.0 }
 0x168   :  { %v467_v38 = vpop.f32.mrf.mxu0 }
 0x16a   :  { %v975_v39 = vpop.f32.mrf.mxu0 }
 0x170   :  { %v654_v44 = vpop.f32.mrf.mxu0 }
 0x171   :  { %659 = vrot.lane.b32.xlu0 %v654_v44, %s1160_s3 }
 0x172   :  { %v1034_v33 = vpop.eup %1033  ;;  %v997_v45 = vpop.f32.mrf.mxu0 }
 0x173   :  { %v310_v34 = vmul.f32 %v1034_v33, %v308_v32 }
 0x175   :  { %v312_v36 = vsel %vm311_vm2, %v308_v32, %v310_v34 }
 0x176   :  { %v315_v37 = vsel %vm313_vm3, %v314_v35, %v312_v36 }
 0x177   :  { %963 = vmatmul.mubr.msk.f32.vlgmr.msra.gmra.mxu1 %vm82_vm1, %v315_v37 }
 0x178   :  { %984 = vmatprep.mubr.msk.f32.mxu1 %vm1157_vm0, %v1156_v0  ;;  %977 = vmatpush3.msra.mxu1 %v489_v40  ;;  %v812_v46 = vpop.f32.mrf.mxu0 }
 0x179   :  { %978 = vmatprep.subr.mxu1 %v1156_v0  ;;  %817 = vrot.lane.b32.xlu1 %v812_v46, %s1160_s3 }
 0x17a   :  { %979 = vmatpush3.msra.mxu1 %v488_v41  ;;  %v1019_v47 = vpop.f32.mrf.mxu0 }
 0x17b   :  { %980 = vmatprep.subr.mxu1 %v1156_v0 }
 0x17c   :  { %981 = vmatpush3.msra.mxu1 %v487_v42 }
 0x17d   :  { %982 = vmatprep.subr.mxu1 %v1156_v0 }
 0x17e   :  { %983 = vmatpush3.msra.mxu1 %v486_v43 }
 0x17f   :  { %998 = vmatprep.subr.mxu1 %v1156_v0 }
 0x1e3   :  { %v660_v61 = vpop.permute.xlu0 %659 }
 0x1eb   :  { %v818_v3 = vpop.permute.xlu1 %817 }
 0x237   :  { %v394_v48 = vpop.f32.mrf.mxu1 }
 0x238   :  { %v468_v50 = vadd.f32 %v467_v38, %v394_v48 }
 0x239   :  { %v964_v51 = vpop.f32.mrf.mxu1 }
 0x23a   :  { %v478_v52 = vadd.f32 %v868_v49, %v468_v50 }
 0x23c   :  { %v869_v53 = vmul.f32 -1.442695, %v478_v52 }
 0x23e   :  { %1035 = vpow2.f32 %v869_v53 }
 0x24b   :  { %v1036_v54 = vpop.eup %1035 }
 0x24c   :  { %v482_v55 = vadd.f32 1.0, %v1036_v54 }
 0x24e   :  { %1037 = vrcp.f32 %v482_v55 }
 0x25b   :  { %v1038_v56 = vpop.eup %1037 }
 0x25c   :  { %v485_v57 = vmul.f32 %v1038_v56, %v478_v52 }
 0x25e   :  { %985 = vmatmul.mubr.msk.f32.vlgmr.msra.gmra.mxu1 %vm82_vm1, %v485_v57 }
 0x25f   :  { %999 = vmatpush3.msra.mxu1 %v1296_v19  ;;  %1006 = vmatprep.mubr.msk.f32.mxu1 %vm1157_vm0, %v1156_v0 }
 0x260   :  { %1000 = vmatprep.subr.mxu1 %v1156_v0 }
 0x261   :  { %1001 = vmatpush3.msra.mxu1 %v1301_v20 }
 0x262   :  { %1002 = vmatprep.subr.mxu1 %v1156_v0 }
 0x263   :  { %1003 = vmatpush3.msra.mxu1 %v1308_v21 }
 0x264   :  { %1004 = vmatprep.subr.mxu1 %v1156_v0 }
 0x265   :  { %1005 = vmatpush3.msra.mxu1 %v1315_v22 }
 0x266   :  { %1007 = vmatmul.mubr.msk.f32.vlgmr.msra.gmra.mxu1 %vm82_vm1, %v664_v58 }
 0x31e   :  { %v566_v60 = vpop.f32.mrf.mxu1 }
 0x31f   :  { %v567_v62 = vadd.f32 %v870_v59, %v566_v60 }
 0x320   :  { %v986_v63 = vpop.f32.mrf.mxu1 }
 0x321   :  { %v872_v1 = vmul.f32 -1.442695, %v567_v62  ;;  %v662_v2 = vmul.f32 %v660_v61, %v567_v62  ;;  %v820_v5 = vmul.f32 %v818_v3, %v567_v62 }
 0x323   :  { %1039 = vpow2.f32 %v872_v1  ;;  %822 = vrot.lane.b32.xlu1 %v662_v2, %s1161_s28 }
 0x326   :  { %v733_v4 = vpop.f32.mrf.mxu1 }
 0x327   :  { %738 = vrot.lane.b32.xlu0 %v733_v4, %s1160_s3 }
 0x328   :  { %v1008_v0 = vpop.f32.mrf.mxu1 }
 0x32b   :  { %826 = vrot.lane.b32.xlu0 %v820_v5, %s1160_s3 }
 0x330   :  { %v1040_v6 = vpop.eup %1039 }
 0x331   :  { %v573_v7 = vadd.f32 1.0, %v1040_v6 }
 0x333   :  { %1041 = vrcp.f32 %v573_v7 }
 0x340   :  { %v1042_v8 = vpop.eup %1041 }
 0x341   :  { %v576_v9 = vmul.f32 %v1042_v8, %v567_v62 }
 0x343   :  { %v577_v10 = vmul.f32 1.6666666, %v576_v9 }
 0x345   :  { %579 = vst.msk [vmem:[#allocation8] sm:$0xff] %vm578_vm4, %v577_v10 }
 0x346   :  { %1114 = shalt.err (!%p1111_p5)
}
 0x347   :  { %842 = dma.vmem_to_hbm [thread:$0]  %s840_s4, 128, %s1379_s9, [#allocation4]   ;;  %vm831_vm5 = vcmask 392192  }
 0x348   :  { %s1163_s11 = smov [#allocation9]  }
 0x349   :  { %s849_s12 = sshll.u32 %s1163_s11, 4  ;;  %s850_s12 = int_to_ptr.vmem [resolvable:$true] %s849_s12 }
 0x34a   :  { %s1123_s13 = scalar_lea.vmem %s850_s12, 128  ;;  %p1128_p7 = scmp.lt.s32.totalorder %s850_s12, %s850_s12 }
 0x34b   :  { %p1124_p6 = scmp.ne.s32.totalorder %s850_s12, %s1123_s13  ;;  %p1129_p8 = scmp.lt.s32.totalorder %s1123_s13, %s1123_s13 }
 0x34d   :  { %p1130_p9 = por %p1129_p8, %p1128_p7 }
 0x34f   :  { %p1131_p10 = pnand %p1130_p9, %p1124_p6 }
 0x395   :  { %v823_v13 = vpop.permute.xlu1 %822 }
 0x399   :  { %v739_v11 = vpop.permute.xlu0 %738 }
 0x39a   :  { %v741_v12 = vmul.f32 %v739_v11, %v567_v62 }
 0x39c   :  { %v829_v14 = vsel %vm578_vm4, %v823_v13, %v741_v12 }
 0x39d   :  { %v827_v15 = vpop.permute.xlu0 %826 }
 0x39e   :  { %v830_v16 = vsel %vm82_vm1, %v829_v14, %v827_v15 }
 0x39f   :  { %832 = vst.msk [vmem:[#allocation9] sm:$0xff] %vm831_vm5, %v830_v16 }
 0x3a0   :  { %1134 = shalt.err (!%p1131_p10)
}
 0x3a1   :  { %852 = dma.vmem_to_hbm [thread:$0]  %s850_s12, 128, %s1380_s10, [#allocation10]  }
 0x3a2   :  { %1147 = dma.done.wait [#allocation4], 128  }
 0x3a3   :  { %1148 = vsyncadd [#allocation4], 4294967168 }
 0x3a4   :  { %1149 = dma.done.wait [#allocation10], 128  }
 0x3a5   :  { %1150 = vsyncadd [#allocation10], 4294967168 }
 0x3a6   :  { %859 = vsyncpa [#allocation3], 1 }
 0x3a7   :  { %860 = vsyncpa [#allocation6], 1 }
 0x3a8   :  { %861 = vsyncpa [#allocation4], 1 }
 0x3a9   :  { %862 = vsyncpa [#allocation10], 1 }

</bundles_post_ra>
